<compile_context>
chip_gen: v7x
topology: tpu7x:2x2x1
jax: 0.10.0
libtpu: 0.0.40
codegen_flags: <defaults>
</compile_context>

<pallas_src>
import math
from functools import partial

import jax
import jax.numpy as jnp
from jax.experimental import pallas as pl
from jax.experimental.pallas import tpu as pltpu

MIB = 1024 * 1024


def _cdiv(a, b):
    return (a + b - 1) // b


def _round_up(a, b):
    return _cdiv(a, b) * b


def _gelu_exact(x):
    # nn.GELU() default is the exact (erf-based) GELU; kept for PyTorch parity.
    # (The tanh approximation would land on the EUP slot on v6e/v7x, but breaks
    # strict parity, so it is not used.)
    return 0.5 * x * (1.0 + jax.lax.erf(x * (1.0 / math.sqrt(2.0))))


# --------------------------------------------------------------------------- #
# Kernels
# --------------------------------------------------------------------------- #

def mlp_kernel_resident(x_ref, wfc_ref, bfc_ref, wproj_ref, bproj_ref, o_ref):
    """Weights fully VMEM-resident: constant weight index maps -> single weight DMA,
    single pass per row tile, no reduction axis, no accumulator scratch.

    x_ref: (tm, C); wfc_ref: (H, C) [out, in]; bfc_ref: (1, H);
    wproj_ref: (H, C) [in, out]; bproj_ref: (1, C); o_ref: (tm, C).
    """
    h = jax.lax.dot_general(
        x_ref[...], wfc_ref[...],
        dimension_numbers=(((1,), (1,)), ((), ())),      # contract the C axes
        preferred_element_type=jnp.float32)
    h = _gelu_exact(h + bfc_ref[...])
    y = jnp.dot(h.astype(wproj_ref.dtype), wproj_ref[...],
                preferred_element_type=jnp.float32)
    # TODO(synk): dropout with p>0 in training mode would need pltpu.prng_* masking;
    # here it is identity (eval mode / p=0.0), matching nn.Dropout.
    o_ref[...] = (y + bproj_ref[...]).astype(o_ref.dtype)


def mlp_kernel_ksplit(x_ref, wfc_ref, bfc_ref, wproj_ref, bproj_ref, o_ref, acc_ref):
    """Hidden dim streamed in contiguous (th, C) slabs; grid axis 1 is the
    reduction ("arbitrary"), output + f32 accumulator resident across it."""
    k = pl.program_id(1)

    @pl.when(k == 0)
    def _():
        acc_ref[...] = jnp.zeros_like(acc_ref)

    h = jax.lax.dot_general(
        x_ref[...], wfc_ref[...],
        dimension_numbers=(((1,), (1,)), ((), ())),
        preferred_element_type=jnp.float32)
    h = _gelu_exact(h + bfc_ref[...])
    acc_ref[...] += jnp.dot(h.astype(wproj_ref.dtype), wproj_ref[...],
                            preferred_element_type=jnp.float32)

    @pl.when(k == pl.num_programs(1) - 1)
    def _():
        # Dropout = identity (eval mode / p=0.0).
        o_ref[...] = (acc_ref[...] + bproj_ref[...]).astype(o_ref.dtype)


# --------------------------------------------------------------------------- #
# Tiling / VMEM heuristics
# --------------------------------------------------------------------------- #

def _tpu_generation():
    """Best-effort (vmem_capacity_bytes, mxu_dim, tensorcores_per_chip).
    Unknown chips fall back to the most restrictive recent assumption (v7x-like)."""
    kind = ""
    try:
        kind = jax.devices()[0].device_kind.lower()
    except Exception:
        pass
    if "v5 lite" in kind or "v5e" in kind or "v5litepod" in kind:
        return 128 * MIB, 128, 1
    if "v5" in kind:                                  # v5p
        return 128 * MIB, 128, 2
    if "v6" in kind:                                  # v6e
        return 128 * MIB, 256, 1
    if "v2" in kind or "v3" in kind:
        return 128 * MIB, 128, 1
    if "v4" in kind:
        return 128 * MIB, 128, 2
    if "v7" in kind or "tpu7" in kind:                # v7x: 64 MiB VMEM, 2 TCs
        return 64 * MIB, 256, 2
    return 64 * MIB, 256, 2


def _choose_row_tile(M, tm_target, num_tc):
    """Largest row tile <= tm_target that (a) keeps padding waste small for ragged
    M (tiles are evened out instead of padding to a full large tile) and (b) yields
    at least num_tc row tiles so the "parallel" axis feeds every TensorCore."""
    MIN = 16                                 # legal for f32 (8) and bf16 (16) sublanes
    tm_target = max(MIN, _round_up(tm_target, MIN))
    n = _cdiv(M, tm_target)
    if num_tc > 1 and M >= num_tc * MIN:
        n = max(n, num_tc)
    return _round_up(_cdiv(M, n), MIN)


def _vmem_need_resident(tm, C, H, x_item, w_item):
    return (2 * 2 * tm * C * x_item          # x + out tiles, double-buffered
            + 2 * 2 * H * C * w_item         # both weights (2 buffers allocated even
                                             #   though constant index map => 1 DMA)
            + 2 * (H + C) * 4                # f32 biases
            + tm * H * 4                     # f32 GELU intermediate
            + tm * C * 4)                    # f32 c_proj result before cast


def _vmem_need_ksplit(tm, th, C, H, x_item, w_item):
    return (2 * 2 * tm * C * x_item          # x + out tiles, double-buffered
            + 2 * 2 * th * C * w_item        # (th, C) slabs of both weights, 2 bufs
            + 2 * (th + C) * 4               # f32 bias slices
            + tm * C * 4                     # f32 accumulator scratch
            + tm * th * 4)                   # f32 GELU intermediate


def _choose_hidden_tile(H, tm, C, x_item, w_item, budget):
    """Return (th, resident). resident=True -> weights live in VMEM for the whole
    kernel; otherwise the hidden dim is streamed in (th, C) slabs."""
    if _vmem_need_resident(tm, C, H, x_item, w_item) <= budget:
        return H, True
    divisors = [d for d in range(H - 1, 0, -1) if H % d == 0]
    cands = [d for d in divisors if d % 128 == 0 or H < 128] or divisors or [H]
    for th in cands:
        if _vmem_need_ksplit(tm, th, C, H, x_item, w_item) <= budget:
            return th, False
    return cands[-1], False


def _vmem_limit(need, budget):
    want = need + need // 4 + 2 * MIB        # +25% margin for compiler temporaries
    if want <= budget:
        return int(max(want, min(32 * MIB, budget)))
    return int(want)                         # over-budget fallback; let Mosaic decide


# --------------------------------------------------------------------------- #
# pallas_call wrappers
# --------------------------------------------------------------------------- #

@partial(jax.jit, static_argnames=("tm", "vmem_limit"))
def _mlp_pallas_resident(x, w_fc_t, b_fc2, w_proj, b_proj2, *, tm, vmem_limit):
    M, C = x.shape
    H = w_fc_t.shape[0]
    x_item = jnp.dtype(x.dtype).itemsize
    w_item = jnp.dtype(w_fc_t.dtype).itemsize

    cost = pl.CostEstimate(
        flops=4 * M * C * H,
        transcendentals=M * H,
        bytes_accessed=int(2 * M * C * x_item + 2 * H * C * w_item + (H + C) * 4),
    )
    return pl.pallas_call(
        mlp_kernel_resident,
        out_shape=jax.ShapeDtypeStruct((M, C), x.dtype),
        grid_spec=pltpu.PrefetchScalarGridSpec(
            num_scalar_prefetch=0,
            grid=(M // tm,),
            in_specs=[
                pl.BlockSpec((tm, C), lambda i: (i, 0)),   # x row tile
                pl.BlockSpec((H, C), lambda i: (0, 0)),    # c_fc weight (resident)
                pl.BlockSpec((1, H), lambda i: (0, 0)),    # c_fc bias
                pl.BlockSpec((H, C), lambda i: (0, 0)),    # c_proj weight (resident)
                pl.BlockSpec((1, C), lambda i: (0, 0)),    # c_proj bias
            ],
            out_specs=pl.BlockSpec((tm, C), lambda i: (i, 0)),
        ),
        compiler_params=pltpu.CompilerParams(
            dimension_semantics=("parallel",),
            vmem_limit_bytes=vmem_limit,
        ),
        cost_estimate=cost,
    )(x, w_fc_t, b_fc2, w_proj, b_proj2)


@partial(jax.jit, static_argnames=("tm", "th", "vmem_limit"))
def _mlp_pallas_ksplit(x, w_fc_t, b_fc2, w_proj, b_proj2, *, tm, th, vmem_limit):
    M, C = x.shape
    H = w_fc_t.shape[0]
    x_item = jnp.dtype(x.dtype).itemsize
    w_item = jnp.dtype(w_fc_t.dtype).itemsize
    n_row_tiles = M // tm

    cost = pl.CostEstimate(
        flops=4 * M * C * H,
        transcendentals=M * H,
        # Weights are re-streamed once per row tile when the k axis is kept.
        bytes_accessed=int(2 * M * C * x_item
                           + n_row_tiles * 2 * H * C * w_item
                           + (H + C) * 4),
    )
    return pl.pallas_call(
        mlp_kernel_ksplit,
        out_shape=jax.ShapeDtypeStruct((M, C), x.dtype),
        grid_spec=pltpu.PrefetchScalarGridSpec(
            num_scalar_prefetch=0,
            grid=(M // tm, H // th),
            in_specs=[
                pl.BlockSpec((tm, C), lambda i, k: (i, 0)),   # x row tile
                pl.BlockSpec((th, C), lambda i, k: (k, 0)),   # c_fc slab (contiguous)
                pl.BlockSpec((1, th), lambda i, k: (0, k)),   # c_fc bias slice
                pl.BlockSpec((th, C), lambda i, k: (k, 0)),   # c_proj slab (contiguous)
                pl.BlockSpec((1, C), lambda i, k: (0, 0)),    # c_proj bias
            ],
            out_specs=pl.BlockSpec((tm, C), lambda i, k: (i, 0)),
            scratch_shapes=[pltpu.VMEM((tm, C), jnp.float32)],
        ),
        compiler_params=pltpu.CompilerParams(
            dimension_semantics=("parallel", "arbitrary"),
            vmem_limit_bytes=vmem_limit,
        ),
        cost_estimate=cost,
    )(x, w_fc_t, b_fc2, w_proj, b_proj2)


def mlp_forward(x, w_fc_t, b_fc, w_proj, b_proj, *, tm_target=512, hidden_tile=None):
    """GPT MLP: dropout(GELU(x @ c_fc.W^T + c_fc.b) @ c_proj.W^T + c_proj.b),
    dropout = identity (eval mode / p = 0.0).

    x:      [M, C]
    w_fc_t: [4C, C]  c_fc weight in nn.Linear (out, in) layout
    b_fc:   [4C]
    w_proj: [4C, C]  c_proj weight pre-transposed to (in, out) = c_proj.weight.T
    b_proj: [C]
    hidden_tile: optional forced hidden-dim slab size (must divide 4C); mostly for
    testing the streamed (k-split) path.
    """
    M, C = x.shape
    H = w_fc_t.shape[0]
    assert w_fc_t.shape == (H, C) and w_proj.shape == (H, C)
    assert b_fc.shape == (H,) and b_proj.shape == (C,)
    x_item = jnp.dtype(x.dtype).itemsize
    w_item = jnp.dtype(w_fc_t.dtype).itemsize

    vmem_cap, _mxu, num_tc = _tpu_generation()
    budget = int(min(0.9 * vmem_cap, vmem_cap - 6 * MIB))   # generation-aware cap

    tm = _choose_row_tile(M, tm_target, num_tc)
    M_pad = _round_up(M, tm)
    if M_pad != M:
        x = jnp.pad(x, ((0, M_pad - M), (0, 0)))

    if hidden_tile is None:
        th, resident = _choose_hidden_tile(H, tm, C, x_item, w_item, budget)
    else:
        assert H % hidden_tile == 0, "hidden_tile must divide 4*n_embd"
        th = int(hidden_tile)
        resident = (th == H
                    and _vmem_need_resident(tm, C, H, x_item, w_item) <= budget)

    b_fc2 = b_fc.reshape(1, H).astype(jnp.float32)      # bias adds stay in f32
    b_proj2 = b_proj.reshape(1, C).astype(jnp.float32)

    if resident:
        need = _vmem_need_resident(tm, C, H, x_item, w_item)
        out = _mlp_pallas_resident(x, w_fc_t, b_fc2, w_proj, b_proj2,
                                   tm=tm, vmem_limit=_vmem_limit(need, budget))
    else:
        need = _vmem_need_ksplit(tm, th, C, H, x_item, w_item)
        out = _mlp_pallas_ksplit(x, w_fc_t, b_fc2, w_proj, b_proj2,
                                 tm=tm, th=th, vmem_limit=_vmem_limit(need, budget))
    return out[:M]


def reference_mlp(x, w_fc_t, b_fc, w_proj, b_proj):
    xf = x.astype(jnp.float32)
    h = jnp.dot(xf, w_fc_t.astype(jnp.float32).T,
                precision=jax.lax.Precision.HIGHEST) + b_fc.astype(jnp.float32)
    h = _gelu_exact(h)
    return jnp.dot(h, w_proj.astype(jnp.float32),
                   precision=jax.lax.Precision.HIGHEST) + b_proj.astype(jnp.float32)


if __name__ == "__main__":
    # Small GPT-like config: batch=2, seq=8, n_embd=32, bias=True, dropout=0.0
    batch, seq, n_embd = 2, 8, 32
    hidden = 4 * n_embd

    key = jax.random.PRNGKey(0)
    kx, k1, k2, k3, k4 = jax.random.split(key, 5)

    x = jax.random.normal(kx, (batch, seq, n_embd), dtype=jnp.float32)
    # Weights in the layouts the kernel consumes (both [4C, C]):
    #   w_fc_t == c_fc.weight (out, in);  w_proj == c_proj.weight.T (in, out).
    w_fc_t = jax.random.normal(k1, (hidden, n_embd), dtype=jnp.float32) * 0.02
    b_fc = jax.random.normal(k2, (hidden,), dtype=jnp.float32) * 0.02
    w_proj = jax.random.normal(k3, (hidden, n_embd), dtype=jnp.float32) * 0.02
    b_proj = jax.random.normal(k4, (n_embd,), dtype=jnp.float32) * 0.02

    x2d = x.reshape(batch * seq, n_embd)

    # 1) f32, weights-resident fast path (exact parity with PyTorch eval-mode MLP).
    out = jax.block_until_ready(mlp_forward(x2d, w_fc_t, b_fc, w_proj, b_proj))
    ref = reference_mlp(x2d, w_fc_t, b_fc, w_proj, b_proj)
    assert out.shape == ref.shape
    assert jnp.allclose(out.astype(jnp.float32), ref, atol=1e-5, rtol=1e-5), \
        "f32 mismatch vs reference"

    # 2) bf16 fast path (bf16 MXU matmuls, f32 accumulation + GELU + bias).
    out_bf16 = jax.block_until_ready(
        mlp_forward(x2d.astype(jnp.bfloat16), w_fc_t.astype(jnp.bfloat16),
                    b_fc, w_proj.astype(jnp.bfloat16), b_proj))
    ref_bf16 = reference_mlp(x2d.astype(jnp.bfloat16), w_fc_t.astype(jnp.bfloat16),
                             b_fc, w_proj.astype(jnp.bfloat16), b_proj)
    assert jnp.allclose(out_bf16.astype(jnp.float32), ref_bf16,
                        atol=2e-2, rtol=2e-2), "bf16 mismatch vs reference"

    # 3) Streamed (k-split) path, forced via hidden_tile, with a ragged row count
    #    to exercise padding, the reduction axis and the f32 accumulator.
    M2, C2 = 50, 128
    H2 = 4 * C2
    kk = jax.random.split(jax.random.PRNGKey(1), 5)
    x2 = jax.random.normal(kk[0], (M2, C2), dtype=jnp.float32)
    wf2 = jax.random.normal(kk[1], (H2, C2), dtype=jnp.float32) * 0.02
    bf2 = jax.random.normal(kk[2], (H2,), dtype=jnp.float32) * 0.02
    wp2 = jax.random.normal(kk[3], (H2, C2), dtype=jnp.float32) * 0.02
    bp2 = jax.random.normal(kk[4], (C2,), dtype=jnp.float32) * 0.02
    out2 = jax.block_until_ready(
        mlp_forward(x2, wf2, bf2, wp2, bp2, hidden_tile=128))
    ref2 = reference_mlp(x2, wf2, bf2, wp2, bp2)
    assert jnp.allclose(out2.astype(jnp.float32), ref2, atol=1e-4, rtol=1e-4), \
        "k-split mismatch vs reference"

    print("KERNEL_OK")
</pallas_src>

<mosaic_0001>
module attributes {stable_mosaic.version = 11 : i64} {
  func.func @mlp_kernel_resident(%arg0: i32, %arg1: memref<16x32xf32, #tpu.memory_space<vmem>>, %arg2: memref<128x32xf32, #tpu.memory_space<vmem>>, %arg3: memref<1x128xf32, #tpu.memory_space<vmem>>, %arg4: memref<128x32xf32, #tpu.memory_space<vmem>>, %arg5: memref<1x32xf32, #tpu.memory_space<vmem>>, %arg6: memref<16x32xf32, #tpu.memory_space<vmem>>) attributes {dimension_semantics = [#tpu.dimension_semantics<parallel>], iteration_bounds = array<i64: 1>, scalar_prefetch = 0 : i64, scratch_operands = 0 : i64, tpu.core_type = #tpu.core_type<tc>, window_params = [{transform_indices = @transform_0, window_bounds = array<i64: 16, 32>}, {pipeline_mode = #tpu.pipeline_mode<synchronous>, transform_indices = @transform_1, window_bounds = array<i64: 128, 32>}, {pipeline_mode = #tpu.pipeline_mode<synchronous>, transform_indices = @transform_2, window_bounds = array<i64: 1, 128>}, {pipeline_mode = #tpu.pipeline_mode<synchronous>, transform_indices = @transform_3, window_bounds = array<i64: 128, 32>}, {pipeline_mode = #tpu.pipeline_mode<synchronous>, transform_indices = @transform_4, window_bounds = array<i64: 1, 32>}, {transform_indices = @transform_5, window_bounds = array<i64: 16, 32>}]} {
    %c0 = arith.constant 0 : index
    %c0_0 = arith.constant 0 : index
    %0 = vector.load %arg1[%c0, %c0_0] : memref<16x32xf32, #tpu.memory_space<vmem>>, vector<16x32xf32>
    %c0_1 = arith.constant 0 : index
    %c0_2 = arith.constant 0 : index
    %1 = vector.load %arg2[%c0_1, %c0_2] : memref<128x32xf32, #tpu.memory_space<vmem>>, vector<128x32xf32>
    %cst = arith.constant dense<0.000000e+00> : vector<16x128xf32>
    %2 = tpu.matmul %0, %1, %cst {dimension_numbers = #tpu.dot_dimension_numbers<[1], [1], [0], [0], [0, 0, 1, 0], [], []>} : vector<16x32xf32>, vector<128x32xf32>, vector<16x128xf32> -> vector<16x128xf32>
    %c0_3 = arith.constant 0 : index
    %c0_4 = arith.constant 0 : index
    %3 = vector.load %arg3[%c0_3, %c0_4] : memref<1x128xf32, #tpu.memory_space<vmem>>, vector<1x128xf32>
    %4 = vector.broadcast %3 : vector<1x128xf32> to vector<16x128xf32>
    %5 = arith.addf %2, %4 : vector<16x128xf32>
    %cst_5 = arith.constant 5.000000e-01 : f32
    %6 = vector.broadcast %cst_5 : f32 to vector<16x128xf32>
    %7 = arith.mulf %6, %5 : vector<16x128xf32>
    %cst_6 = arith.constant 0.707106769 : f32
    %8 = vector.broadcast %cst_6 : f32 to vector<16x128xf32>
    %9 = arith.mulf %5, %8 : vector<16x128xf32>
    %10 = math.erf %9 : vector<16x128xf32>
    %cst_7 = arith.constant 1.000000e+00 : f32
    %11 = vector.broadcast %cst_7 : f32 to vector<16x128xf32>
    %12 = arith.addf %11, %10 : vector<16x128xf32>
    %13 = arith.mulf %7, %12 : vector<16x128xf32>
    %c0_8 = arith.constant 0 : index
    %c0_9 = arith.constant 0 : index
    %14 = vector.load %arg4[%c0_8, %c0_9] : memref<128x32xf32, #tpu.memory_space<vmem>>, vector<128x32xf32>
    %cst_10 = arith.constant dense<0.000000e+00> : vector<16x32xf32>
    %15 = tpu.matmul %13, %14, %cst_10 {dimension_numbers = #tpu.dot_dimension_numbers<[1], [0], [0], [1], [0, 0, 1, 1], [], []>} : vector<16x128xf32>, vector<128x32xf32>, vector<16x32xf32> -> vector<16x32xf32>
    %c0_11 = arith.constant 0 : index
    %c0_12 = arith.constant 0 : index
    %16 = vector.load %arg5[%c0_11, %c0_12] : memref<1x32xf32, #tpu.memory_space<vmem>>, vector<1x32xf32>
    %17 = vector.broadcast %16 : vector<1x32xf32> to vector<16x32xf32>
    %18 = arith.addf %15, %17 : vector<16x32xf32>
    %c0_13 = arith.constant 0 : index
    %c0_14 = arith.constant 0 : index
    %19 = vector.load %arg6[%c0_13, %c0_14] : memref<16x32xf32, #tpu.memory_space<vmem>>, vector<16x32xf32>
    tpu.vector_store %arg6[%c0_13, %c0_14], %18 {strides = array<i32>} : memref<16x32xf32, #tpu.memory_space<vmem>>, vector<16x32xf32>,
    return
  }
  func.func @transform_0(%arg0: i32) -> (i32, i32) {
    %c0_i32 = arith.constant 0 : i32
    %c0_i32_0 = arith.constant 0 : i32
    return %arg0, %c0_i32 : i32, i32
  }
  func.func @transform_1(%arg0: i32) -> (i32, i32) {
    %c0_i32 = arith.constant 0 : i32
    %c0_i32_0 = arith.constant 0 : i32
    %c0_i32_1 = arith.constant 0 : i32
    return %c0_i32, %c0_i32_0 : i32, i32
  }
  func.func @transform_2(%arg0: i32) -> (i32, i32) {
    %c0_i32 = arith.constant 0 : i32
    %c0_i32_0 = arith.constant 0 : i32
    %c0_i32_1 = arith.constant 0 : i32
    return %c0_i32, %c0_i32_0 : i32, i32
  }
  func.func @transform_3(%arg0: i32) -> (i32, i32) {
    %c0_i32 = arith.constant 0 : i32
    %c0_i32_0 = arith.constant 0 : i32
    %c0_i32_1 = arith.constant 0 : i32
    return %c0_i32, %c0_i32_0 : i32, i32
  }
  func.func @transform_4(%arg0: i32) -> (i32, i32) {
    %c0_i32 = arith.constant 0 : i32
    %c0_i32_0 = arith.constant 0 : i32
    %c0_i32_1 = arith.constant 0 : i32
    return %c0_i32, %c0_i32_0 : i32, i32
  }
  func.func @transform_5(%arg0: i32) -> (i32, i32) {
    %c0_i32 = arith.constant 0 : i32
    %c0_i32_0 = arith.constant 0 : i32
    return %arg0, %c0_i32 : i32, i32
  }
}

</mosaic_0001>

<bundles_post_ra>
// kernel: _mlp_pallas_resident.1
= control target key start
LH: loop header
LB: loop body
LE: loop exit
PB: predicated region body
PF: predicated region fallthrough
CT: control target
= control target key end

     0   :  { %vm46_vm0 = vcmask 261120   ;;  %s734_s0 = inlined_call_operand.vmem [shape: f32[16,32], index: 0, kind: input, shape index: {}]   ;;  %s735_s1 = inlined_call_operand.vmem [shape: f32[128,32], index: 1, kind: input, shape index: {}]   ;;  %s736_s2 = inlined_call_operand.vmem [shape: f32[1,128], index: 2, kind: input, shape index: {}]   ;;  %s737_s3 = inlined_call_operand.vmem [shape: f32[128,32], index: 3, kind: input, shape index: {}]   ;;  %s738_s4 = inlined_call_operand.vmem [shape: f32[1,32], index: 4, kind: input, shape index: {}]   ;;  %s739_s5 = inlined_call_operand.hbm [shape: f32[16,32], index: 5, kind: output, shape index: {}]  }
   0x1   :  { %v23_v0 = vld [vmem:[%s735_s1] sm:$0xff]  ;;  %v24_v1 = vld [vmem:[%s735_s1 + $0x8] sm:$0xff]  ;;  %v25_v2 = vld [vmem:[%s735_s1 + $0x10] sm:$0xff] }
   0x2   :  { %v428_v3 = vpack.c.bf16 %v24_v1, %v23_v0  ;;  %vm583_vm1 = vmpackc.low %vm46_vm0, %vm46_vm0  ;;  %v26_v5 = vld [vmem:[%s735_s1 + $0x18] sm:$0xff]  ;;  %v27_v7 = vld [vmem:[%s735_s1 + $0x20] sm:$0xff] }
   0x3   :  { %v434_v6 = vpack.c.bf16 %v26_v5, %v25_v2  ;;  %v21_v8 = vld [vmem:[%s734_s0] sm:$0xff]  ;;  %v28_v9 = vld [vmem:[%s735_s1 + $0x28] sm:$0xff]  ;;  %v188_v13 = vld [vmem:[%s737_s3 + $0x10] sm:$0xff] }
   0x4   :  { %430 = vmatprep.subr.msk.bf16.mxu0 %vm583_vm1, %v428_v3  ;;  %390 = vmatprep.mubr.msk.f32.mxu0 %vm46_vm0, %v21_v8  ;;  %v186_v10 = vld [vmem:[%s737_s3] sm:$0xff]  ;;  %v187_v11 = vld [vmem:[%s737_s3 + $0x8] sm:$0xff]  ;;  %v189_v14 = vld [vmem:[%s737_s3 + $0x18] sm:$0xff] }
   0x5   :  { %433 = vmatpush3.bf16.xpose.msk.msra.mxu0 %vm583_vm1, %v428_v3  ;;  %v476_v12 = vpack.c.bf16 %v187_v11, %v186_v10  ;;  %v480_v15 = vpack.c.bf16 %v189_v14, %v188_v13  ;;  %v190_v16 = vld [vmem:[%s737_s3 + $0x20] sm:$0xff]  ;;  %v191_v17 = vld [vmem:[%s737_s3 + $0x28] sm:$0xff] }
   0x6   :  { %436 = vmatprep.subr.msk.bf16.mxu0 %vm583_vm1, %v434_v6 }
   0x7   :  { %10 = vsyncpa [#allocation3], 0  ;;  %v440_v18 = vpack.c.bf16 %v28_v9, %v27_v7  ;;  %477 = vmatprep.subr.bf16.mxu1 %v476_v12  ;;  %v484_v19 = vpack.c.bf16 %v191_v17, %v190_v16  ;;  %v29_v20 = vld [vmem:[%s735_s1 + $0x30] sm:$0xff]  ;;  %v30_v21 = vld [vmem:[%s735_s1 + $0x38] sm:$0xff]  ;;  %s539_s11 = smov [#allocation2]  }
   0x8   :  { %479 = vmatpush3.bf16.msra.mxu1 %v476_v12  ;;  %v446_v22 = vpack.c.bf16 %v30_v21, %v29_v20  ;;  %v31_v23 = vld [vmem:[%s735_s1 + $0x40] sm:$0xff]  ;;  %v32_v24 = vld [vmem:[%s735_s1 + $0x48] sm:$0xff]  ;;  %v33_v26 = vld [vmem:[%s735_s1 + $0x50] sm:$0xff]  ;;  %s291_s12 = sshll.u32 %s539_s11, 4  ;;  %s292_s12 = int_to_ptr.vmem [resolvable:$true] %s291_s12 }
   0x9   :  { %481 = vmatprep.subr.bf16.mxu1 %v480_v15  ;;  %v452_v25 = vpack.c.bf16 %v32_v24, %v31_v23  ;;  %v34_v27 = vld [vmem:[%s735_s1 + $0x58] sm:$0xff]  ;;  %v35_v29 = vld [vmem:[%s735_s1 + $0x60] sm:$0xff]  ;;  %v36_v30 = vld [vmem:[%s735_s1 + $0x68] sm:$0xff]  ;;  %s515_s13 = scalar_lea.vmem %s292_s12, 256  ;;  %p520_p1 = scmp.lt.s32.totalorder %s292_s12, %s292_s12 }
   0xa   :  { %v458_v28 = vpack.c.bf16 %v34_v27, %v33_v26  ;;  %v464_v31 = vpack.c.bf16 %v36_v30, %v35_v29  ;;  %v37_v32 = vld [vmem:[%s735_s1 + $0x70] sm:$0xff]  ;;  %v38_v33 = vld [vmem:[%s735_s1 + $0x78] sm:$0xff]  ;;  %v22_v35 = vld [vmem:[%s734_s0 + $0x8] sm:$0xff]  ;;  %p516_p0 = scmp.ne.s32.totalorder %s292_s12, %s515_s13  ;;  %p521_p2 = scmp.lt.s32.totalorder %s515_s13, %s515_s13 }
   0xb   :  { %v470_v34 = vpack.c.bf16 %v38_v33, %v37_v32  ;;  %v192_v36 = vld [vmem:[%s737_s3 + $0x30] sm:$0xff]  ;;  %v193_v37 = vld [vmem:[%s737_s3 + $0x38] sm:$0xff]  ;;  %v194_v39 = vld [vmem:[%s737_s3 + $0x40] sm:$0xff] }
   0xc   :  { %483 = vmatpush3.bf16.msra.mxu1 %v480_v15  ;;  %v488_v38 = vpack.c.bf16 %v193_v37, %v192_v36  ;;  %v195_v40 = vld [vmem:[%s737_s3 + $0x48] sm:$0xff]  ;;  %v196_v42 = vld [vmem:[%s737_s3 + $0x50] sm:$0xff]  ;;  %v197_v43 = vld [vmem:[%s737_s3 + $0x58] sm:$0xff]  ;;  %p522_p3 = por %p521_p2, %p520_p1 }
   0xd   :  { %439 = vmatpush3.bf16.xpose.msk.msra.mxu0 %vm583_vm1, %v434_v6  ;;  %485 = vmatprep.subr.bf16.mxu1 %v484_v19  ;;  %v492_v41 = vpack.c.bf16 %v195_v40, %v194_v39  ;;  %v496_v44 = vpack.c.bf16 %v197_v43, %v196_v42  ;;  %v198_v45 = vld [vmem:[%s737_s3 + $0x60] sm:$0xff]  ;;  %v199_v46 = vld [vmem:[%s737_s3 + $0x68] sm:$0xff]  ;;  %v200_v48 = vld [vmem:[%s737_s3 + $0x70] sm:$0xff] }
   0xe   :  { %442 = vmatprep.subr.msk.bf16.mxu0 %vm583_vm1, %v440_v18  ;;  %v500_v47 = vpack.c.bf16 %v199_v46, %v198_v45  ;;  %v201_v49 = vld [vmem:[%s737_s3 + $0x78] sm:$0xff]  ;;  %v302_v51 = vld [vmem:[%s736_s2] ss:$0 sm:$0xff]  ;;  %p523_p4 = pnand %p522_p3, %p516_p0 }
   0xf   :  { %v504_v50 = vpack.c.bf16 %v201_v49, %v200_v48  ;;  %v321_v2 = vld [vmem:[%s738_s4] ss:$0 sm:$0xff] }
  0x10   :  { %487 = vmatpush3.bf16.msra.mxu1 %v484_v19 }
  0x11   :  { %489 = vmatprep.subr.bf16.mxu1 %v488_v38 }
  0x14   :  { %491 = vmatpush3.bf16.msra.mxu1 %v488_v38 }
  0x15   :  { %445 = vmatpush3.bf16.xpose.msk.msra.mxu0 %vm583_vm1, %v440_v18  ;;  %493 = vmatprep.subr.bf16.mxu1 %v492_v41 }
  0x16   :  { %448 = vmatprep.subr.msk.bf16.mxu0 %vm583_vm1, %v446_v22 }
  0x18   :  { %495 = vmatpush3.bf16.msra.mxu1 %v492_v41 }
  0x19   :  { %497 = vmatprep.subr.bf16.mxu1 %v496_v44 }
  0x1c   :  { %499 = vmatpush3.bf16.msra.mxu1 %v496_v44 }
  0x1d   :  { %451 = vmatpush3.bf16.xpose.msk.msra.mxu0 %vm583_vm1, %v446_v22  ;;  %501 = vmatprep.subr.bf16.mxu1 %v500_v47 }
  0x1e   :  { %454 = vmatprep.subr.msk.bf16.mxu0 %vm583_vm1, %v452_v25 }
  0x20   :  { %503 = vmatpush3.bf16.msra.mxu1 %v500_v47 }
  0x21   :  { %505 = vmatprep.subr.bf16.mxu1 %v504_v50 }
  0x24   :  { %507 = vmatpush3.bf16.msra.mxu1 %v504_v50 }
  0x25   :  { %457 = vmatpush3.bf16.xpose.msk.msra.mxu0 %vm583_vm1, %v452_v25 }
  0x26   :  { %460 = vmatprep.subr.msk.bf16.mxu0 %vm583_vm1, %v458_v28 }
  0x2d   :  { %463 = vmatpush3.bf16.xpose.msk.msra.mxu0 %vm583_vm1, %v458_v28 }
  0x2e   :  { %466 = vmatprep.subr.msk.bf16.mxu0 %vm583_vm1, %v464_v31 }
  0x35   :  { %469 = vmatpush3.bf16.xpose.msk.msra.mxu0 %vm583_vm1, %v464_v31 }
  0x36   :  { %472 = vmatprep.subr.msk.bf16.mxu0 %vm583_vm1, %v470_v34 }
  0x3d   :  { %475 = vmatpush3.bf16.xpose.msk.msra.mxu0 %vm583_vm1, %v470_v34 }
  0x44   :  { %391 = vmatmul.mubr.msk.f32.vlgmr.msra.gmra.mrb[0].mxu0 %vm46_vm0, %v22_v35 }
 0x117   :  { %v392_v52 = vpop.f32.mrb[0].mxu0 }
 0x118   :  { %v173_v53 = vadd.f32 %v392_v52, %v302_v51  ;;  %v167_v54 = vpop.f32.mrb[1].mxu0 }
 0x119   :  { %v168_v55 = vadd.f32 %v302_v51, %v167_v54 }
 0x11a   :  { %v179_v56 = vmul.f32 0.70710677, %v173_v53  ;;  %v177_v63 = vmul.f32 0.5, %v173_v53 }
 0x11b   :  { %v178_v57 = vmul.f32 0.70710677, %v168_v55  ;;  %v176_v61 = vmul.f32 0.5, %v168_v55 }
 0x11c   :  { %511 = verf.f32 %v179_v56 }
 0x11d   :  { %513 = verf.f32 %v178_v57 }
 0x126   :  { %v512_v58 = vpop.eup %511 }
 0x127   :  { %v514_v59 = vpop.eup %513  ;;  %v183_v60 = vadd.f32 1.0, %v512_v58 }
 0x128   :  { %v182_v62 = vadd.f32 1.0, %v514_v59 }
 0x129   :  { %v185_v1 = vmul.f32 %v183_v60, %v177_v63 }
 0x12a   :  { %v184_v0 = vmul.f32 %v182_v62, %v176_v61 }
 0x12c   :  { %425 = vmatprep.mubr.f32.mxu1 %v184_v0 }
 0x12d   :  { %426 = vmatmul.mubr.f32.vlgmr.msra.gmra.mrb[0].mxu1 %v185_v1 }
 0x200   :  { %v427_v3 = vpop.f32.mrb[0].mxu1 }
 0x201   :  { %v281_v4 = vadd.f32 %v427_v3, %v321_v2  ;;  %v275_v5 = vpop.f32.mrb[1].mxu1 }
 0x202   :  { %v276_v6 = vadd.f32 %v321_v2, %v275_v5 }
 0x203   :  { %285 = vst.msk [vmem:[#allocation2 + $0x8] sm:$0xff] %vm46_vm0, %v281_v4 }
 0x204   :  { %284 = vst.msk [vmem:[#allocation2] sm:$0xff] %vm46_vm0, %v276_v6 }
 0x205   :  { %526 = shalt.err (!%p523_p4)
}
 0x206   :  { %s527_s15 = scalar_lea.hbm %s739_s5, 256 }
 0x207   :  { %p528_p5 = scmp.ne.s32.totalorder %s739_s5, %s527_s15  ;;  %p531_p6 = scmp.lt.u32.totalorder %s527_s15, %s739_s5 }
 0x209   :  { %p533_p7 = pnand %p531_p6, %p528_p5 }
 0x20b   :  { %536 = shalt.err (!%p533_p7)
}
 0x20c   :  { %s540_s19 = smov 128   ;;  %s541_s20 = smov 8  }
 0x20d   :  { %297 = dma.vmem_to_hbm [thread:$0]  %s292_s12, 256, %s739_s5, [#allocation3], %s540_s19, %s540_s19, %s541_s20  }
 0x20e   :  { %537 = dma.done.wait [#allocation3], 256  }
 0x20f   :  { %538 = vsyncadd [#allocation3], 4294967040 }
 0x210   :  { %301 = vsyncpa [#allocation3], 1 }

</bundles_post_ra>
